<compile_context>
chip_gen: v5e
topology: v5e:2x2
jax: 0.10.0
libtpu: 0.0.40
codegen_flags: <defaults>
</compile_context>

<pallas_src>
import functools

import jax
import jax.numpy as jnp
from jax.experimental import pallas as pl
from jax.experimental.pallas import tpu as pltpu

LANE = 128
SUBLANE = 8
BF16_SUBLANE = 16       # bf16 packs 16 rows per 32-bit sublane
MAX_BATCH_TILE = 2048   # rows per grid step when B is large


def _round_up(x, m):
    return (x + m - 1) // m * m


def critic_kernel(s_ref, a_ref, w1s_ref, w1a_ref, b1_ref,
                  w2_ref, b2_ref, w3_ref, b3_ref, o_ref):
    # Layer 1: fused concat as split-K bf16 matmuls; f32 accumulate/bias/ReLU.
    h1 = (jnp.dot(s_ref[...], w1s_ref[...], preferred_element_type=jnp.float32)
          + jnp.dot(a_ref[...], w1a_ref[...], preferred_element_type=jnp.float32)
          + b1_ref[...])
    h1 = jnp.maximum(h1, 0.0).astype(jnp.bfloat16)

    # Layer 2: bf16 matmul, f32 bias/ReLU.
    h2 = jnp.dot(h1, w2_ref[...], preferred_element_type=jnp.float32) + b2_ref[...]
    h2 = jnp.maximum(h2, 0.0).astype(jnp.bfloat16)

    # Layer 3 (no activation). Store bf16: halves the padded-output writeback.
    out = jnp.dot(h2, w3_ref[...], preferred_element_type=jnp.float32) + b3_ref[...]
    o_ref[...] = out.astype(o_ref.dtype)


def init_critic_params(key, input_size, hidden_size, output_size):
    """Deterministic init mimicking nn.Linear's uniform(-1/sqrt(fan_in), +1/sqrt(fan_in))."""
    ks = jax.random.split(key, 6)

    def lin(kw, kb, fan_in, fan_out):
        bound = 1.0 / jnp.sqrt(jnp.float32(fan_in))
        w = jax.random.uniform(kw, (fan_in, fan_out), jnp.float32, -bound, bound)
        b = jax.random.uniform(kb, (1, fan_out), jnp.float32, -bound, bound)
        return w, b

    w1, b1 = lin(ks[0], ks[1], input_size, hidden_size)
    w2, b2 = lin(ks[2], ks[3], hidden_size, hidden_size)
    w3, b3 = lin(ks[4], ks[5], hidden_size, output_size)
    return (w1, b1, w2, b2, w3, b3)


def prepare_critic_params(params, state_dim):
    """One-time prep: split W1 into [state|action] row blocks, zero-pad all
    feature dims to a multiple of 128 (lane-dense), and cast weights to bf16
    (biases stay f32 for exact f32 bias-add)."""
    w1, b1, w2, b2, w3, b3 = params
    hidden = w1.shape[1]
    out = w3.shape[1]
    hp = _round_up(hidden, LANE)
    op = _round_up(out, LANE)

    def pad_to(x, rows, cols):
        return jnp.pad(x, ((0, rows - x.shape[0]), (0, cols - x.shape[1])))

    w1s = pad_to(w1[:state_dim, :], state_dim, hp).astype(jnp.bfloat16)
    w1a = pad_to(w1[state_dim:, :], w1.shape[0] - state_dim, hp).astype(jnp.bfloat16)
    b1p = pad_to(b1, 1, hp)                                   # f32
    w2p = pad_to(w2, hp, hp).astype(jnp.bfloat16)
    b2p = pad_to(b2, 1, hp)                                   # f32
    w3p = pad_to(w3, hp, op).astype(jnp.bfloat16)
    b3p = pad_to(b3, 1, op)                                   # f32
    kparams = (w1s, w1a, b1p, w2p, b2p, w3p, b3p)
    return kparams, out


@functools.partial(jax.jit, static_argnames=("output_size",))
def critic_forward(state, action, kparams, output_size):
    """state: (B, state_dim), action: (B, action_dim). Returns (B, output_size) f32."""
    w1s, w1a, b1, w2, b2, w3, b3 = kparams
    # Module does .float(); we feed the (native-bf16) MXU bf16 and keep all
    # accumulation in f32 inside the kernel.
    state = state.astype(jnp.bfloat16)
    action = action.astype(jnp.bfloat16)

    B, S = state.shape
    A = action.shape[1]
    Hp = w2.shape[0]      # padded hidden (multiple of 128)
    Op = w3.shape[1]      # padded output (multiple of 128)

    # Batch tiling:
    #  * tiny B: one full-array block (always layout-legal).
    #  * otherwise: >=2 tiles (~B/2 rows each, 16-row aligned for bf16) so
    #    v7x's two TensorCores both get work; capped at MAX_BATCH_TILE so very
    #    large B pipelines with few, big steps and bounded VMEM.
    if B > 2 * SUBLANE:
        TB = min(_round_up(pl.cdiv(B, 2), BF16_SUBLANE), MAX_BATCH_TILE)
    else:
        TB = B
    grid = (pl.cdiv(B, TB),)

    resident = lambda i: (0, 0)   # weights/biases stay in VMEM across batch tiles
    batched = lambda i: (i, 0)

    flops = 2 * B * (S * Hp + A * Hp + Hp * Hp + Hp * Op)
    bytes_accessed = (2 * B * (S + A + Op)                        # bf16 activations/output
                      + 2 * ((S + A) * Hp + Hp * Hp + Hp * Op)    # bf16 weights
                      + 4 * (2 * Hp + Op))                        # f32 biases

    out_padded = pl.pallas_call(
        critic_kernel,
        out_shape=jax.ShapeDtypeStruct((B, Op), jnp.bfloat16),
        grid=grid,
        in_specs=[
            pl.BlockSpec((TB, S), batched),     # state tile (bf16)
            pl.BlockSpec((TB, A), batched),     # action tile (bf16)
            pl.BlockSpec((S, Hp), resident),    # W1 state rows (bf16)
            pl.BlockSpec((A, Hp), resident),    # W1 action rows (bf16)
            pl.BlockSpec((1, Hp), resident),    # b1 (f32)
            pl.BlockSpec((Hp, Hp), resident),   # W2 (bf16)
            pl.BlockSpec((1, Hp), resident),    # b2 (f32)
            pl.BlockSpec((Hp, Op), resident),   # W3 (bf16)
            pl.BlockSpec((1, Op), resident),    # b3 (f32)
        ],
        out_specs=pl.BlockSpec((TB, Op), batched),
        compiler_params=pltpu.CompilerParams(
            dimension_semantics=("parallel",),
            vmem_limit_bytes=32 * 1024 * 1024),
        cost_estimate=pl.CostEstimate(
            flops=flops, transcendentals=0, bytes_accessed=bytes_accessed),
    )(state, action, w1s, w1a, b1, w2, b2, w3, b3)

    # Drop the zero-padded output lanes; return f32 to match module semantics.
    return out_padded[:, :output_size].astype(jnp.float32)


if __name__ == "__main__":
    # Small shapes consistent with the module: Critic(input_size, hidden, output)
    batch = 8
    state_dim = 24
    action_dim = 8
    input_size = state_dim + action_dim  # 32
    hidden_size = 32
    output_size = 1

    key = jax.random.PRNGKey(0)
    kp, ks, ka = jax.random.split(key, 3)

    params = init_critic_params(kp, input_size, hidden_size, output_size)
    kparams, out_feats = prepare_critic_params(params, state_dim)

    state = jax.random.normal(ks, (batch, state_dim), jnp.float32)
    action = jax.random.normal(ka, (batch, action_dim), jnp.float32)

    out = critic_forward(state, action, kparams, out_feats)
    out = jax.block_until_ready(out)

    # Pure-JAX f32 reference against the original (unpadded) parameters.
    # Tolerance loosened for the bf16 matmul path (f32 accumulation inside).
    w1, b1, w2, b2, w3, b3 = params
    x = jnp.concatenate([state, action], axis=1)
    ref = jnp.maximum(x @ w1 + b1, 0.0)
    ref = jnp.maximum(ref @ w2 + b2, 0.0)
    ref = ref @ w3 + b3

    assert out.shape == (batch, output_size)
    assert jnp.allclose(out, ref, atol=5e-2, rtol=5e-2)

    print("KERNEL_OK")
</pallas_src>

<mosaic_0001>
module attributes {stable_mosaic.version = 11 : i64} {
  func.func @critic_kernel(%arg0: i32, %arg1: memref<8x24xbf16, #tpu.memory_space<vmem>>, %arg2: memref<8x8xbf16, #tpu.memory_space<vmem>>, %arg3: memref<24x128xbf16, #tpu.memory_space<vmem>>, %arg4: memref<8x128xbf16, #tpu.memory_space<vmem>>, %arg5: memref<1x128xf32, #tpu.memory_space<vmem>>, %arg6: memref<128x128xbf16, #tpu.memory_space<vmem>>, %arg7: memref<1x128xf32, #tpu.memory_space<vmem>>, %arg8: memref<128x128xbf16, #tpu.memory_space<vmem>>, %arg9: memref<1x128xf32, #tpu.memory_space<vmem>>, %arg10: memref<8x128xbf16, #tpu.memory_space<vmem>>) attributes {dimension_semantics = [#tpu.dimension_semantics<parallel>], iteration_bounds = array<i64: 1>, scalar_prefetch = 0 : i64, scratch_operands = 0 : i64, tpu.core_type = #tpu.core_type<tc>, window_params = [{transform_indices = @transform_0, window_bounds = array<i64: 8, 24>}, {transform_indices = @transform_1, window_bounds = array<i64: 8, 8>}, {pipeline_mode = #tpu.pipeline_mode<synchronous>, transform_indices = @transform_2, window_bounds = array<i64: 24, 128>}, {pipeline_mode = #tpu.pipeline_mode<synchronous>, transform_indices = @transform_3, window_bounds = array<i64: 8, 128>}, {pipeline_mode = #tpu.pipeline_mode<synchronous>, transform_indices = @transform_4, window_bounds = array<i64: 1, 128>}, {pipeline_mode = #tpu.pipeline_mode<synchronous>, transform_indices = @transform_5, window_bounds = array<i64: 128, 128>}, {pipeline_mode = #tpu.pipeline_mode<synchronous>, transform_indices = @transform_6, window_bounds = array<i64: 1, 128>}, {pipeline_mode = #tpu.pipeline_mode<synchronous>, transform_indices = @transform_7, window_bounds = array<i64: 128, 128>}, {pipeline_mode = #tpu.pipeline_mode<synchronous>, transform_indices = @transform_8, window_bounds = array<i64: 1, 128>}, {transform_indices = @transform_9, window_bounds = array<i64: 8, 128>}]} {
    %c0 = arith.constant 0 : index
    %c0_0 = arith.constant 0 : index
    %0 = vector.load %arg1[%c0, %c0_0] : memref<8x24xbf16, #tpu.memory_space<vmem>>, vector<8x24xbf16>
    %c0_1 = arith.constant 0 : index
    %c0_2 = arith.constant 0 : index
    %1 = vector.load %arg3[%c0_1, %c0_2] : memref<24x128xbf16, #tpu.memory_space<vmem>>, vector<24x128xbf16>
    %cst = arith.constant dense<0.000000e+00> : vector<8x128xf32>
    %2 = tpu.matmul %0, %1, %cst {dimension_numbers = #tpu.dot_dimension_numbers<[1], [0], [0], [1], [0, 0, 1, 1], [], []>} : vector<8x24xbf16>, vector<24x128xbf16>, vector<8x128xf32> -> vector<8x128xf32>
    %c0_3 = arith.constant 0 : index
    %c0_4 = arith.constant 0 : index
    %3 = vector.load %arg2[%c0_3, %c0_4] : memref<8x8xbf16, #tpu.memory_space<vmem>>, vector<8x8xbf16>
    %c0_5 = arith.constant 0 : index
    %c0_6 = arith.constant 0 : index
    %4 = vector.load %arg4[%c0_5, %c0_6] : memref<8x128xbf16, #tpu.memory_space<vmem>>, vector<8x128xbf16>
    %cst_7 = arith.constant dense<0.000000e+00> : vector<8x128xf32>
    %5 = tpu.matmul %3, %4, %cst_7 {dimension_numbers = #tpu.dot_dimension_numbers<[1], [0], [0], [1], [0, 0, 1, 1], [], []>} : vector<8x8xbf16>, vector<8x128xbf16>, vector<8x128xf32> -> vector<8x128xf32>
    %6 = arith.addf %2, %5 : vector<8x128xf32>
    %c0_8 = arith.constant 0 : index
    %c0_9 = arith.constant 0 : index
    %7 = vector.load %arg5[%c0_8, %c0_9] : memref<1x128xf32, #tpu.memory_space<vmem>>, vector<1x128xf32>
    %8 = vector.broadcast %7 : vector<1x128xf32> to vector<8x128xf32>
    %9 = arith.addf %6, %8 : vector<8x128xf32>
    %cst_10 = arith.constant 0.000000e+00 : f32
    %10 = vector.broadcast %cst_10 : f32 to vector<8x128xf32>
    %11 = arith.maximumf %9, %10 : vector<8x128xf32>
    %12 = arith.truncf %11 : vector<8x128xf32> to vector<8x128xbf16>
    %c0_11 = arith.constant 0 : index
    %c0_12 = arith.constant 0 : index
    %13 = vector.load %arg6[%c0_11, %c0_12] : memref<128x128xbf16, #tpu.memory_space<vmem>>, vector<128x128xbf16>
    %cst_13 = arith.constant dense<0.000000e+00> : vector<8x128xf32>
    %14 = tpu.matmul %12, %13, %cst_13 {dimension_numbers = #tpu.dot_dimension_numbers<[1], [0], [0], [1], [0, 0, 1, 1], [], []>} : vector<8x128xbf16>, vector<128x128xbf16>, vector<8x128xf32> -> vector<8x128xf32>
    %c0_14 = arith.constant 0 : index
    %c0_15 = arith.constant 0 : index
    %15 = vector.load %arg7[%c0_14, %c0_15] : memref<1x128xf32, #tpu.memory_space<vmem>>, vector<1x128xf32>
    %16 = vector.broadcast %15 : vector<1x128xf32> to vector<8x128xf32>
    %17 = arith.addf %14, %16 : vector<8x128xf32>
    %cst_16 = arith.constant 0.000000e+00 : f32
    %18 = vector.broadcast %cst_16 : f32 to vector<8x128xf32>
    %19 = arith.maximumf %17, %18 : vector<8x128xf32>
    %20 = arith.truncf %19 : vector<8x128xf32> to vector<8x128xbf16>
    %c0_17 = arith.constant 0 : index
    %c0_18 = arith.constant 0 : index
    %21 = vector.load %arg8[%c0_17, %c0_18] : memref<128x128xbf16, #tpu.memory_space<vmem>>, vector<128x128xbf16>
    %cst_19 = arith.constant dense<0.000000e+00> : vector<8x128xf32>
    %22 = tpu.matmul %20, %21, %cst_19 {dimension_numbers = #tpu.dot_dimension_numbers<[1], [0], [0], [1], [0, 0, 1, 1], [], []>} : vector<8x128xbf16>, vector<128x128xbf16>, vector<8x128xf32> -> vector<8x128xf32>
    %c0_20 = arith.constant 0 : index
    %c0_21 = arith.constant 0 : index
    %23 = vector.load %arg9[%c0_20, %c0_21] : memref<1x128xf32, #tpu.memory_space<vmem>>, vector<1x128xf32>
    %24 = vector.broadcast %23 : vector<1x128xf32> to vector<8x128xf32>
    %25 = arith.addf %22, %24 : vector<8x128xf32>
    %26 = arith.truncf %25 : vector<8x128xf32> to vector<8x128xbf16>
    %c0_22 = arith.constant 0 : index
    %c0_23 = arith.constant 0 : index
    %27 = vector.load %arg10[%c0_22, %c0_23] : memref<8x128xbf16, #tpu.memory_space<vmem>>, vector<8x128xbf16>
    tpu.vector_store %arg10[%c0_22, %c0_23], %26 {strides = array<i32>} : memref<8x128xbf16, #tpu.memory_space<vmem>>, vector<8x128xbf16>,
    return
  }
  func.func @transform_0(%arg0: i32) -> (i32, i32) {
    %c0_i32 = arith.constant 0 : i32
    %c0_i32_0 = arith.constant 0 : i32
    return %arg0, %c0_i32 : i32, i32
  }
  func.func @transform_1(%arg0: i32) -> (i32, i32) {
    %c0_i32 = arith.constant 0 : i32
    %c0_i32_0 = arith.constant 0 : i32
    return %arg0, %c0_i32 : i32, i32
  }
  func.func @transform_2(%arg0: i32) -> (i32, i32) {
    %c0_i32 = arith.constant 0 : i32
    %c0_i32_0 = arith.constant 0 : i32
    %c0_i32_1 = arith.constant 0 : i32
    return %c0_i32, %c0_i32_0 : i32, i32
  }
  func.func @transform_3(%arg0: i32) -> (i32, i32) {
    %c0_i32 = arith.constant 0 : i32
    %c0_i32_0 = arith.constant 0 : i32
    %c0_i32_1 = arith.constant 0 : i32
    return %c0_i32, %c0_i32_0 : i32, i32
  }
  func.func @transform_4(%arg0: i32) -> (i32, i32) {
    %c0_i32 = arith.constant 0 : i32
    %c0_i32_0 = arith.constant 0 : i32
    %c0_i32_1 = arith.constant 0 : i32
    return %c0_i32, %c0_i32_0 : i32, i32
  }
  func.func @transform_5(%arg0: i32) -> (i32, i32) {
    %c0_i32 = arith.constant 0 : i32
    %c0_i32_0 = arith.constant 0 : i32
    %c0_i32_1 = arith.constant 0 : i32
    return %c0_i32, %c0_i32_0 : i32, i32
  }
  func.func @transform_6(%arg0: i32) -> (i32, i32) {
    %c0_i32 = arith.constant 0 : i32
    %c0_i32_0 = arith.constant 0 : i32
    %c0_i32_1 = arith.constant 0 : i32
    return %c0_i32, %c0_i32_0 : i32, i32
  }
  func.func @transform_7(%arg0: i32) -> (i32, i32) {
    %c0_i32 = arith.constant 0 : i32
    %c0_i32_0 = arith.constant 0 : i32
    %c0_i32_1 = arith.constant 0 : i32
    return %c0_i32, %c0_i32_0 : i32, i32
  }
  func.func @transform_8(%arg0: i32) -> (i32, i32) {
    %c0_i32 = arith.constant 0 : i32
    %c0_i32_0 = arith.constant 0 : i32
    %c0_i32_1 = arith.constant 0 : i32
    return %c0_i32, %c0_i32_0 : i32, i32
  }
  func.func @transform_9(%arg0: i32) -> (i32, i32) {
    %c0_i32 = arith.constant 0 : i32
    %c0_i32_0 = arith.constant 0 : i32
    return %arg0, %c0_i32 : i32, i32
  }
}

</mosaic_0001>

<bundles_post_ra>
// kernel: critic_forward.1
= control target key start
LH: loop header
LB: loop body
LE: loop exit
PB: predicated region body
PF: predicated region fallthrough
CT: control target
= control target key end

     0   :  { %14 = vsyncpa [#allocation3], 0  ;;  %s533_s0 = inlined_call_operand.vmem [shape: bf16[8,24], index: 0, kind: input, shape index: {}]   ;;  %s534_s1 = inlined_call_operand.vmem [shape: bf16[8,8], index: 1, kind: input, shape index: {}]   ;;  %s535_s2 = inlined_call_operand.vmem [shape: bf16[24,128], index: 2, kind: input, shape index: {}]   ;;  %s536_s3 = inlined_call_operand.vmem [shape: bf16[8,128], index: 3, kind: input, shape index: {}]   ;;  %s537_s4 = inlined_call_operand.vmem [shape: f32[1,128], index: 4, kind: input, shape index: {}]   ;;  %s538_s5 = inlined_call_operand.hbm [shape: bf16[128,128], index: 5, kind: input, shape index: {}]   ;;  %s539_s6 = inlined_call_operand.vmem [shape: f32[1,128], index: 6, kind: input, shape index: {}]   ;;  %s540_s7 = inlined_call_operand.hbm [shape: bf16[128,128], index: 7, kind: input, shape index: {}]   ;;  %s541_s8 = inlined_call_operand.vmem [shape: f32[1,128], index: 8, kind: input, shape index: {}]   ;;  %s542_s9 = inlined_call_operand.vmem [shape: bf16[8,128], index: 9, kind: output, shape index: {}]  }
   0x1   :  { %s30_s11 = sshll.u32 %s538_s5, 4  ;;  %s31_s11 = int_to_ptr.hbm [resolvable:$true] %s30_s11 }
   0x2   :  { %15 = vsyncpa [#allocation5], 0  ;;  %s446_s12 = smov [#allocation2]   ;;  %s45_s16 = sshll.u32 %s540_s7, 4  ;;  %s46_s16 = int_to_ptr.hbm [resolvable:$true] %s45_s16 }
   0x3   :  { %s32_s13 = sshll.u32 %s446_s12, 4  ;;  %s447_s17 = smov 64   ;;  %s33_s13 = int_to_ptr.vmem [resolvable:$true] %s32_s13 }
   0x4   :  { %s448_s18 = smov 4   ;;  %s449_s19 = smov [#allocation4]  }
   0x5   :  { %38 = dma.hbm_to_vmem [thread:$0]  %s31_s11, 1024, %s33_s13, [#allocation3], %s447_s17, %s447_s17, %s448_s18  }
   0x6   :  { %s47_s20 = sshll.u32 %s449_s19, 4  ;;  %s48_s20 = int_to_ptr.vmem [resolvable:$true] %s47_s20 }
   0x7   :  { %53 = dma.hbm_to_vmem [thread:$0]  %s46_s16, 1024, %s48_s20, [#allocation5], %s447_s17, %s447_s17, %s448_s18  }
   0x8   :  { %442 = dma.done.wait [#allocation3], 1024  }
   0x9   :  { %443 = vsyncadd [#allocation3], 4294966272 }
   0xa   :  { %444 = dma.done.wait [#allocation5], 1024  }
   0xb   :  { %445 = vsyncadd [#allocation5], 4294966272  ;;  %vm75_vm0 = vcmask 1043456   ;;  %v70_v0 = vld [vmem:[%s536_s3] sm:$0xf]  ;;  %v378_v4 = vld [vmem:[#allocation2 + $0x38] sm:$0xff] }
   0xc   :  { %v68_v1 = vld [vmem:[%s535_s2 + $0x8] sm:$0xf]  ;;  %v77_v2 = vsel %vm75_vm0, %v70_v0, 0  ;;  %v69_v5 = vld [vmem:[%s534_s1] sm:$0xf]  ;;  %vm71_vm1 = vcmask 64512   ;;  %196 = vmatpush.bf16.msra.mxu2 %v378_v4 }
   0xd   :  { %v97_v3 = vunpack.c.l.b16 %v68_v1  ;;  %86 = vmatpush.bf16.msra.mxu0 %v77_v2  ;;  %v377_v6 = vld [vmem:[#allocation2 + $0x30] sm:$0xff]  ;;  %v370_v9 = vld [vmem:[%s535_s2] sm:$0xff]  ;;  %v376_v10 = vld [vmem:[#allocation2 + $0x28] sm:$0xff]  ;;  %vm101_vm2 = vcmask 195584  }
   0xe   :  { %v65_v11 = vld [vmem:[%s533_s0] sm:$0xf]  ;;  %v374_v13 = vld [vmem:[#allocation2 + $0x18] sm:$0xff]  ;;  %v373_v14 = vld [vmem:[#allocation2 + $0x10] sm:$0xff] }
   0xf   :  { %v99_v7 = vpack.c.b16 %v97_v3, %v97_v3  ;;  %v375_v12 = vld [vmem:[#allocation2 + $0x20] sm:$0xff]  ;;  %v372_v15 = vld [vmem:[#allocation2 + $0x8] sm:$0xff]  ;;  %v386_v17 = vld [vmem:[#allocation4 + $0x38] sm:$0xff] }
  0x10   :  { %300 = vmatmul.msk.bf16.vlgmr.msra.gmra.mxu0 %vm71_vm1, %v69_v5  ;;  %197 = vmatpush.bf16.msra.mxu2 %v377_v6  ;;  %v371_v16 = vld [vmem:[#allocation2] sm:$0xff]  ;;  %v385_v18 = vld [vmem:[#allocation4 + $0x30] sm:$0xff]  ;;  %v384_v19 = vld [vmem:[#allocation4 + $0x28] sm:$0xff] }
  0x11   :  { %v106_v8 = vsel %vm75_vm0, %v99_v7, 0  ;;  %279 = vmatpush.bf16.msra.mxu3 %v386_v17  ;;  %v383_v20 = vld [vmem:[#allocation4 + $0x20] sm:$0xff]  ;;  %v382_v21 = vld [vmem:[#allocation4 + $0x18] sm:$0xff]  ;;  %v381_v23 = vld [vmem:[#allocation4 + $0x10] sm:$0xff] }
  0x12   :  { %114 = vmatpush.bf16.msra.mxu1 %v106_v8  ;;  %v391_v24 = vld [vmem:[%s537_s4] ss:$0 sm:$0xff]  ;;  %v380_v32 = vld [vmem:[#allocation4 + $0x8] sm:$0xff] }
  0x13   :  { %v379_v33 = vld [vmem:[#allocation4] sm:$0xff] }
  0x14   :  { %198 = vmatpush.bf16.msra.mxu2 %v376_v10  ;;  %v392_v34 = vld [vmem:[%s539_s6] ss:$0 sm:$0xff] }
  0x15   :  { %280 = vmatpush.bf16.msra.mxu3 %v385_v18  ;;  %v393_v40 = vld [vmem:[%s541_s8] ss:$0 sm:$0xff] }
  0x16   :  { %115 = vmatpush.bf16.msra.mxu1 %v370_v9 }
  0x18   :  { %199 = vmatpush.bf16.msra.mxu2 %v375_v12 }
  0x19   :  { %305 = vmatmul.msk.bf16.vlgmr.msra.gmra.mxu1 %vm101_vm2, %v65_v11  ;;  %281 = vmatpush.bf16.msra.mxu3 %v384_v19 }
  0x1c   :  { %200 = vmatpush.bf16.msra.mxu2 %v374_v13 }
  0x1d   :  { %282 = vmatpush.bf16.msra.mxu3 %v383_v20 }
  0x20   :  { %201 = vmatpush.bf16.msra.mxu2 %v373_v14 }
  0x21   :  { %283 = vmatpush.bf16.msra.mxu3 %v382_v21 }
  0x24   :  { %202 = vmatpush.bf16.msra.mxu2 %v372_v15 }
  0x25   :  { %284 = vmatpush.bf16.msra.mxu3 %v381_v23 }
  0x28   :  { %203 = vmatpush.bf16.msra.mxu2 %v371_v16 }
  0x29   :  { %285 = vmatpush.bf16.msra.mxu3 %v380_v32 }
  0x2d   :  { %286 = vmatpush.bf16.msra.mxu3 %v379_v33 }
  0x8d   :  { %v88_v22 = vpop.f32.mrf.mxu0 }
  0x95   :  { %v90_v25 = vpop.f32.mrf.mxu0 }
  0x96   :  { %v117_v26 = vpop.f32.mrf.mxu1 }
  0x97   :  { %v118_v27 = vadd.f32 %v117_v26, %v88_v22 }
  0x99   :  { %v125_v28 = vadd.f32 %v391_v24, %v118_v27 }
  0x9b   :  { %v126_v29 = vmax.f32 %v125_v28, 0.0 }
  0x9d   :  { %v127_v30 = vpack.c.bf16 %v126_v29, %v126_v29 }
  0x9e   :  { %v119_v31 = vpop.f32.mrf.mxu1 }
  0x9f   :  { %204 = vmatmul.bf16.vlgmr.msra.gmra.mxu2 %v127_v30 }
 0x122   :  { %v205_v35 = vpop.f32.mrf.mxu2 }
 0x123   :  { %v206_v36 = vadd.f32 %v392_v34, %v205_v35 }
 0x125   :  { %v209_v37 = vmax.f32 %v206_v36, 0.0 }
 0x127   :  { %v210_v38 = vpack.c.bf16 %v209_v37, %v209_v37 }
 0x129   :  { %287 = vmatmul.bf16.vlgmr.msra.gmra.mxu3 %v210_v38 }
 0x12a   :  { %v207_v39 = vpop.f32.mrf.mxu2 }
 0x1ac   :  { %v288_v41 = vpop.f32.mrf.mxu3 }
 0x1ad   :  { %v289_v42 = vadd.f32 %v393_v40, %v288_v41 }
 0x1af   :  { %v292_v43 = vpack.c.bf16 %v289_v42, %v289_v42 }
 0x1b1   :  { %293 = vst [vmem:[%s542_s9] sm:$0xf] %v292_v43 }
 0x1b4   :  { %v290_v44 = vpop.f32.mrf.mxu3 }
 0x1b5   :  { %298 = vsyncpa [#allocation3], 1 }
 0x1b6   :  { %299 = vsyncpa [#allocation5], 1 }

</bundles_post_ra>
